<compile_context>
chip_gen: v5e
topology: v5e:2x2
jax: 0.10.0
libtpu: 0.0.40
codegen_flags: <defaults>
</compile_context>

<pallas_src>
import jax
import jax.numpy as jnp
from jax.experimental import pallas as pl
from jax.experimental.pallas import tpu as pltpu

LANE = 128  # TPU lane width


def _round_up(n, m):
    return ((n + m - 1) // m) * m


# ----------------------------- Pallas kernel --------------------------------
def _policy_mlp_kernel(x_ref, w0_ref, w_ref, b_ref, out_ref):
    """One batch tile of the actor-critic MLP, entirely in VMEM.

    x:   [TB, obs]      f32
    w0:  [obs, HP]      bf16  (HP = hidden padded to 128; padded cols are zero)
    w:   [3, HP, HP]    bf16  stacked: [0]=w1, [1]=w2, [2]=fused heads
                              (fused head: [:, :A] actor, [:, A] critic, rest zero)
    b:   [4, HP]        f32   stacked biases: b0, b1, b2, fused-head bias
    out: [TB, HP]       f32   lane-dense slab -> unmasked stores; wrapper slices it
    """
    x = x_ref[...].astype(jnp.bfloat16)
    h = jnp.tanh(jnp.dot(x, w0_ref[...],
                         preferred_element_type=jnp.float32) + b_ref[0:1, :])
    h = jnp.tanh(jnp.dot(h.astype(jnp.bfloat16), w_ref[0],
                         preferred_element_type=jnp.float32) + b_ref[1:2, :])
    h = jnp.tanh(jnp.dot(h.astype(jnp.bfloat16), w_ref[1],
                         preferred_element_type=jnp.float32) + b_ref[2:3, :])
    out_ref[...] = (jnp.dot(h.astype(jnp.bfloat16), w_ref[2],
                            preferred_element_type=jnp.float32)
                    + b_ref[3:4, :]).astype(out_ref.dtype)


# -------------------------------- wrapper ------------------------------------
def policy_forward(x, padded_params, actions_n, *, block_b=1024, min_tiles=2):
    """x: [B, obs_space] f32 -> (logits [B, A], state_value [B, 1])."""
    w0, w_stack, b_stack = padded_params
    B, obs = x.shape
    HP = w_stack.shape[1]
    OUTP = w_stack.shape[2]

    # Balanced batch tiles: multiple of 8 sublanes, at most block_b rows,
    # at least min_tiles grid steps when B allows it (v7x dual-TC sharding),
    # and near-minimal tail padding (<= 7 rows per tile boundary).
    block_b = max(8, _round_up(int(block_b), 8))
    n_tiles = max(min_tiles, -(-B // block_b))
    TB = min(block_b, _round_up(-(-B // n_tiles), 8))
    Bp = _round_up(B, TB)
    if Bp != B:
        x = jnp.pad(x, ((0, Bp - B), (0, 0)))
    grid = (Bp // TB,)

    def const_spec(shape):
        # Weights/biases: full-array block, resident in VMEM across all grid steps.
        return pl.BlockSpec(shape, lambda i: tuple(0 for _ in shape))

    flops = 2 * Bp * (obs * HP + 2 * HP * HP + HP * OUTP)
    transcendentals = 3 * Bp * HP  # tanh
    bytes_accessed = (4 * Bp * obs + 4 * Bp * OUTP            # f32 activations / out
                      + 2 * (obs * HP + 2 * HP * HP + HP * OUTP)  # bf16 weights
                      + 4 * 4 * HP)                            # f32 biases

    out = pl.pallas_call(
        _policy_mlp_kernel,
        out_shape=jax.ShapeDtypeStruct((Bp, OUTP), jnp.float32),
        grid=grid,
        in_specs=[
            pl.BlockSpec((TB, obs), lambda i: (i, 0)),   # batch-tiled activations
            const_spec(w0.shape),
            const_spec(w_stack.shape),
            const_spec(b_stack.shape),
        ],
        out_specs=pl.BlockSpec((TB, OUTP), lambda i: (i, 0)),
        compiler_params=pltpu.CompilerParams(
            dimension_semantics=("parallel",)),          # shard batch across TCs (v7x)
        cost_estimate=pl.CostEstimate(flops=flops,
                                      transcendentals=transcendentals,
                                      bytes_accessed=bytes_accessed),
    )(x, w0, w_stack, b_stack)

    # Single device-side slice of the lane-dense slab, then split.
    head = out[:B, :actions_n + 1]
    logits = head[:, :actions_n]
    value = head[:, actions_n:actions_n + 1]
    return logits, value


# ------------------------- deterministic parameter init ----------------------
def init_params(key, obs_space, hidden_size, actions_n):
    """torch.nn.Linear-style uniform init, weights stored [in, out]."""
    ks = jax.random.split(key, 5)

    def linear(k, fan_in, fan_out):
        kw, kb = jax.random.split(k)
        bound = 1.0 / jnp.sqrt(jnp.float32(fan_in))
        w = jax.random.uniform(kw, (fan_in, fan_out), jnp.float32, -bound, bound)
        b = jax.random.uniform(kb, (1, fan_out), jnp.float32, -bound, bound)
        return w, b

    w0, b0 = linear(ks[0], obs_space, hidden_size)
    w1, b1 = linear(ks[1], hidden_size, hidden_size)
    w2, b2 = linear(ks[2], hidden_size, hidden_size)
    wa, ba = linear(ks[3], hidden_size, actions_n)
    wv, bv = linear(ks[4], hidden_size, 1)
    return (w0, b0, w1, b1, w2, b2, wa, ba, wv, bv)


def pad_params(params, lane=LANE):
    """One-time host-side prep: fuse heads, zero-pad hidden dims to 128, stack.

    Zero padding (weights AND biases) keeps numerics exact: tanh(0)=0 propagates,
    and padded output lanes are zero and sliced off before softmax/sampling.
    Weights are pre-cast to bf16 (MXU operands); biases stay f32.
    """
    w0, b0, w1, b1, w2, b2, wa, ba, wv, bv = params
    obs, H = w0.shape
    A = wa.shape[1]
    HP = _round_up(H, lane)
    assert HP == lane, "stacked-weight layout assumes hidden_size <= 128"
    assert A + 1 <= lane, "fused actor+critic head must fit in 128 lanes"

    def pad2(m, rows, cols):
        return jnp.pad(m, ((0, rows - m.shape[0]), (0, cols - m.shape[1])))

    wh = jnp.concatenate([wa, wv], axis=1)   # fused actor||critic head [H, A+1]
    bh = jnp.concatenate([ba, bv], axis=1)

    w0p = pad2(w0, obs, HP).astype(jnp.bfloat16)
    w_stack = jnp.stack([pad2(w1, HP, HP),
                         pad2(w2, HP, HP),
                         pad2(wh, HP, HP)]).astype(jnp.bfloat16)      # [3, HP, HP]
    b_stack = jnp.concatenate([pad2(b0, 1, HP), pad2(b1, 1, HP),
                               pad2(b2, 1, HP), pad2(bh, 1, HP)], axis=0)  # [4, HP] f32
    return w0p, w_stack, b_stack


# --------------------------------- reference ---------------------------------
def policy_forward_ref(x, params):
    (w0, b0, w1, b1, w2, b2, wa, ba, wv, bv) = params
    h = jnp.tanh(x @ w0 + b0)
    h = jnp.tanh(h @ w1 + b1)
    h = jnp.tanh(h @ w2 + b2)
    return h @ wa + ba, h @ wv + bv


if __name__ == "__main__":
    # Shapes consistent with the module: observation_space.shape = (4, 4)
    # -> obs_space = 16 (flattened, as the policy's forward does with .view(B,-1));
    # Discrete(6) action space -> actions_n = 6; hidden_size = 64, layers_num = 3.
    OBS_SHAPE = (4, 4)
    OBS_SPACE = OBS_SHAPE[0] * OBS_SHAPE[1]
    HIDDEN = 64
    ACTIONS_N = 6

    key = jax.random.PRNGKey(0)
    k_obs, k_params = jax.random.split(key)

    params = init_params(k_params, OBS_SPACE, HIDDEN, ACTIONS_N)
    padded = pad_params(params)

    # bf16 MXU operands -> loosened tolerance vs. the f32 reference.
    ATOL = 2e-2
    RTOL = 2e-2

    ok = True
    for B in (8, 20):   # B=20 exercises grid=2 + tail padding
        obs = jax.random.normal(jax.random.fold_in(k_obs, B),
                                (B,) + OBS_SHAPE, dtype=jnp.float32)
        x = obs.reshape(B, OBS_SPACE)  # flatten observations

        logits, value = jax.block_until_ready(
            policy_forward(x, padded, ACTIONS_N))

        ref_logits, ref_value = policy_forward_ref(x, params)
        ok &= logits.shape == (B, ACTIONS_N) and value.shape == (B, 1)
        ok &= bool(jnp.allclose(logits, ref_logits, atol=ATOL, rtol=RTOL))
        ok &= bool(jnp.allclose(value, ref_value, atol=ATOL, rtol=RTOL))

    assert ok
    print("KERNEL_OK")
</pallas_src>

<mosaic_0001>
module attributes {stable_mosaic.version = 11 : i64} {
  func.func @_policy_mlp_kernel(%arg0: i32, %arg1: memref<8x16xf32, #tpu.memory_space<vmem>>, %arg2: memref<16x128xbf16, #tpu.memory_space<vmem>>, %arg3: memref<3x128x128xbf16, #tpu.memory_space<vmem>>, %arg4: memref<4x128xf32, #tpu.memory_space<vmem>>, %arg5: memref<8x128xf32, #tpu.memory_space<vmem>>) attributes {dimension_semantics = [#tpu.dimension_semantics<parallel>], iteration_bounds = array<i64: 1>, scalar_prefetch = 0 : i64, scratch_operands = 0 : i64, tpu.core_type = #tpu.core_type<tc>, window_params = [{transform_indices = @transform_0, window_bounds = array<i64: 8, 16>}, {pipeline_mode = #tpu.pipeline_mode<synchronous>, transform_indices = @transform_1, window_bounds = array<i64: 16, 128>}, {pipeline_mode = #tpu.pipeline_mode<synchronous>, transform_indices = @transform_2, window_bounds = array<i64: 3, 128, 128>}, {pipeline_mode = #tpu.pipeline_mode<synchronous>, transform_indices = @transform_3, window_bounds = array<i64: 4, 128>}, {transform_indices = @transform_4, window_bounds = array<i64: 8, 128>}]} {
    %c0 = arith.constant 0 : index
    %c0_0 = arith.constant 0 : index
    %0 = vector.load %arg1[%c0, %c0_0] : memref<8x16xf32, #tpu.memory_space<vmem>>, vector<8x16xf32>
    %1 = arith.truncf %0 : vector<8x16xf32> to vector<8x16xbf16>
    %c0_1 = arith.constant 0 : index
    %c0_2 = arith.constant 0 : index
    %2 = vector.load %arg2[%c0_1, %c0_2] : memref<16x128xbf16, #tpu.memory_space<vmem>>, vector<16x128xbf16>
    %cst = arith.constant dense<0.000000e+00> : vector<8x128xf32>
    %3 = tpu.matmul %1, %2, %cst {dimension_numbers = #tpu.dot_dimension_numbers<[1], [0], [0], [1], [0, 0, 1, 1], [], []>} : vector<8x16xbf16>, vector<16x128xbf16>, vector<8x128xf32> -> vector<8x128xf32>
    %c0_3 = arith.constant 0 : index
    %c0_4 = arith.constant 0 : index
    %4 = vector.load %arg4[%c0_3, %c0_4] : memref<4x128xf32, #tpu.memory_space<vmem>>, vector<1x128xf32>
    %5 = vector.broadcast %4 : vector<1x128xf32> to vector<8x128xf32>
    %6 = arith.addf %3, %5 : vector<8x128xf32>
    %7 = math.tanh %6 : vector<8x128xf32>
    %8 = arith.truncf %7 : vector<8x128xf32> to vector<8x128xbf16>
    %c0_5 = arith.constant 0 : index
    %c0_6 = arith.constant 0 : index
    %c0_7 = arith.constant 0 : index
    %9 = vector.load %arg3[%c0_5, %c0_6, %c0_7] : memref<3x128x128xbf16, #tpu.memory_space<vmem>>, vector<1x128x128xbf16>
    %10 = vector.shape_cast %9 : vector<1x128x128xbf16> to vector<128x128xbf16>
    %cst_8 = arith.constant dense<0.000000e+00> : vector<8x128xf32>
    %11 = tpu.matmul %8, %10, %cst_8 {dimension_numbers = #tpu.dot_dimension_numbers<[1], [0], [0], [1], [0, 0, 1, 1], [], []>} : vector<8x128xbf16>, vector<128x128xbf16>, vector<8x128xf32> -> vector<8x128xf32>
    %c1 = arith.constant 1 : index
    %c0_9 = arith.constant 0 : index
    %12 = vector.load %arg4[%c1, %c0_9] : memref<4x128xf32, #tpu.memory_space<vmem>>, vector<1x128xf32>
    %13 = vector.broadcast %12 : vector<1x128xf32> to vector<8x128xf32>
    %14 = arith.addf %11, %13 : vector<8x128xf32>
    %15 = math.tanh %14 : vector<8x128xf32>
    %16 = arith.truncf %15 : vector<8x128xf32> to vector<8x128xbf16>
    %c1_10 = arith.constant 1 : index
    %c0_11 = arith.constant 0 : index
    %c0_12 = arith.constant 0 : index
    %17 = vector.load %arg3[%c1_10, %c0_11, %c0_12] : memref<3x128x128xbf16, #tpu.memory_space<vmem>>, vector<1x128x128xbf16>
    %18 = vector.shape_cast %17 : vector<1x128x128xbf16> to vector<128x128xbf16>
    %cst_13 = arith.constant dense<0.000000e+00> : vector<8x128xf32>
    %19 = tpu.matmul %16, %18, %cst_13 {dimension_numbers = #tpu.dot_dimension_numbers<[1], [0], [0], [1], [0, 0, 1, 1], [], []>} : vector<8x128xbf16>, vector<128x128xbf16>, vector<8x128xf32> -> vector<8x128xf32>
    %c2 = arith.constant 2 : index
    %c0_14 = arith.constant 0 : index
    %20 = vector.load %arg4[%c2, %c0_14] : memref<4x128xf32, #tpu.memory_space<vmem>>, vector<1x128xf32>
    %21 = vector.broadcast %20 : vector<1x128xf32> to vector<8x128xf32>
    %22 = arith.addf %19, %21 : vector<8x128xf32>
    %23 = math.tanh %22 : vector<8x128xf32>
    %24 = arith.truncf %23 : vector<8x128xf32> to vector<8x128xbf16>
    %c2_15 = arith.constant 2 : index
    %c0_16 = arith.constant 0 : index
    %c0_17 = arith.constant 0 : index
    %25 = vector.load %arg3[%c2_15, %c0_16, %c0_17] : memref<3x128x128xbf16, #tpu.memory_space<vmem>>, vector<1x128x128xbf16>
    %26 = vector.shape_cast %25 : vector<1x128x128xbf16> to vector<128x128xbf16>
    %cst_18 = arith.constant dense<0.000000e+00> : vector<8x128xf32>
    %27 = tpu.matmul %24, %26, %cst_18 {dimension_numbers = #tpu.dot_dimension_numbers<[1], [0], [0], [1], [0, 0, 1, 1], [], []>} : vector<8x128xbf16>, vector<128x128xbf16>, vector<8x128xf32> -> vector<8x128xf32>
    %c3 = arith.constant 3 : index
    %c0_19 = arith.constant 0 : index
    %28 = vector.load %arg4[%c3, %c0_19] : memref<4x128xf32, #tpu.memory_space<vmem>>, vector<1x128xf32>
    %29 = vector.broadcast %28 : vector<1x128xf32> to vector<8x128xf32>
    %30 = arith.addf %27, %29 : vector<8x128xf32>
    %c0_20 = arith.constant 0 : index
    %c0_21 = arith.constant 0 : index
    %31 = vector.load %arg5[%c0_20, %c0_21] : memref<8x128xf32, #tpu.memory_space<vmem>>, vector<8x128xf32>
    tpu.vector_store %arg5[%c0_20, %c0_21], %30 {strides = array<i32>} : memref<8x128xf32, #tpu.memory_space<vmem>>, vector<8x128xf32>,
    return
  }
  func.func @transform_0(%arg0: i32) -> (i32, i32) {
    %c0_i32 = arith.constant 0 : i32
    %c0_i32_0 = arith.constant 0 : i32
    return %arg0, %c0_i32 : i32, i32
  }
  func.func @transform_1(%arg0: i32) -> (i32, i32) {
    %c0_i32 = arith.constant 0 : i32
    %c0_i32_0 = arith.constant 0 : i32
    %c0_i32_1 = arith.constant 0 : i32
    return %c0_i32, %c0_i32_0 : i32, i32
  }
  func.func @transform_2(%arg0: i32) -> (i32, i32, i32) {
    %c0_i32 = arith.constant 0 : i32
    %c0_i32_0 = arith.constant 0 : i32
    %c0_i32_1 = arith.constant 0 : i32
    %c0_i32_2 = arith.constant 0 : i32
    return %c0_i32, %c0_i32_0, %c0_i32_1 : i32, i32, i32
  }
  func.func @transform_3(%arg0: i32) -> (i32, i32) {
    %c0_i32 = arith.constant 0 : i32
    %c0_i32_0 = arith.constant 0 : i32
    %c0_i32_1 = arith.constant 0 : i32
    return %c0_i32, %c0_i32_0 : i32, i32
  }
  func.func @transform_4(%arg0: i32) -> (i32, i32) {
    %c0_i32 = arith.constant 0 : i32
    %c0_i32_0 = arith.constant 0 : i32
    return %arg0, %c0_i32 : i32, i32
  }
}

</mosaic_0001>

<bundles_post_ra>
// kernel: tpu_custom_call.1
= control target key start
LH: loop header
LB: loop body
LE: loop exit
PB: predicated region body
PF: predicated region fallthrough
CT: control target
= control target key end

     0   :  { %9 = vsyncpa [#allocation3], 0  ;;  %s690_s0 = inlined_call_operand.hbm [shape: f32[8,16], index: 0, kind: input, shape index: {}]   ;;  %s691_s1 = inlined_call_operand.hbm [shape: bf16[16,128], index: 1, kind: input, shape index: {}]   ;;  %s692_s2 = inlined_call_operand.hbm [shape: bf16[3,128,128], index: 2, kind: input, shape index: {}]   ;;  %s693_s3 = inlined_call_operand.hbm [shape: f32[4,128], index: 3, kind: input, shape index: {}]   ;;  %s694_s4 = inlined_call_operand.hbm [shape: f32[8,128], index: 4, kind: output, shape index: {}]  }
   0x1   :  { %10 = vsyncpa [#allocation6], 0 }
   0x2   :  { %11 = vsyncpa [#allocation9], 0  ;;  %s28_s17 = sshll.u32 %s691_s1, 4  ;;  %s29_s17 = int_to_ptr.hbm [resolvable:$true] %s28_s17 }
   0x3   :  { %12 = vsyncpa [#allocation4], 0  ;;  %s643_s18 = smov [#allocation5]   ;;  %s18_s22 = sshll.u32 %s690_s0, 4  ;;  %s19_s22 = int_to_ptr.hbm [resolvable:$true] %s18_s22 }
   0x4   :  { %s30_s19 = sshll.u32 %s643_s18, 4  ;;  %s644_s23 = smov 64   ;;  %s31_s19 = int_to_ptr.vmem [resolvable:$true] %s30_s19 }
   0x5   :  { %s645_s24 = smov 4   ;;  %s646_s25 = smov [#allocation2]  }
   0x6   :  { %36 = dma.hbm_to_vmem [thread:$0]  %s29_s17, 128, %s31_s19, [#allocation6], %s644_s23, %s644_s23, %s645_s24  }
   0x7   :  { %s20_s26 = sshll.u32 %s646_s25, 4  ;;  %s41_s29 = sshll.u32 %s692_s2, 4  ;;  %s21_s26 = int_to_ptr.vmem [resolvable:$true] %s20_s26  ;;  %s42_s29 = int_to_ptr.hbm [resolvable:$true] %s41_s29 }
   0x8   :  { %23 = dma.hbm_to_vmem [thread:$0]  %s19_s22, 128, %s21_s26, [#allocation3]  }
   0x9   :  { %s55_s5 = sshll.u32 %s693_s3, 4  ;;  %s647_s6 = smov [#allocation7]   ;;  %s56_s5 = int_to_ptr.hbm [resolvable:$true] %s55_s5 }
   0xa   :  { %s43_s7 = sshll.u32 %s647_s6, 4  ;;  %s648_s0 = smov [#allocation8]   ;;  %s44_s7 = int_to_ptr.vmem [resolvable:$true] %s43_s7 }
   0xb   :  { %49 = dma.hbm_to_vmem [thread:$0]  %s42_s29, 3072, %s44_s7, [#allocation6], %s644_s23, %s644_s23, %s645_s24  }
   0xc   :  { %s57_s8 = sshll.u32 %s648_s0, 4  ;;  %s58_s8 = int_to_ptr.vmem [resolvable:$true] %s57_s8 }
   0xd   :  { %60 = dma.hbm_to_vmem [thread:$0]  %s56_s5, 64, %s58_s8, [#allocation9]  }
   0xe   :  { %635 = dma.done.wait [#allocation3], 128  }
   0xf   :  { %636 = vsyncadd [#allocation3], 4294967168 }
  0x10   :  { %637 = dma.done.wait [#allocation6], 3200  }
  0x11   :  { %638 = vsyncadd [#allocation6], 4294964096 }
  0x12   :  { %639 = dma.done.wait [#allocation9], 64  }
  0x13   :  { %640 = vsyncadd [#allocation9], 4294967232  ;;  %v473_v0 = vld [vmem:[#allocation5] sm:$0xff]  ;;  %v78_v1 = vld [vmem:[#allocation2] sm:$0xff]  ;;  %vm90_vm0 = vcmask 130048   ;;  %s649_s2 = smov [#allocation10]  }
  0x14   :  { %v481_v2 = vld [vmem:[#allocation7 + $0x38] sm:$0xff]  ;;  %v79_v3 = vpack.c.bf16 %v78_v1, %v78_v1  ;;  %101 = vmatpush.bf16.msra.mxu0 %v473_v0  ;;  %v480_v4 = vld [vmem:[#allocation7 + $0x30] sm:$0xff]  ;;  %v479_v5 = vld [vmem:[#allocation7 + $0x28] sm:$0xff]  ;;  %s358_s3 = sshll.u32 %s649_s2, 4  ;;  %s360_s11 = sshll.u32 %s694_s4, 4  ;;  %s359_s3 = int_to_ptr.vmem [resolvable:$true] %s358_s3  ;;  %s361_s11 = int_to_ptr.hbm [resolvable:$true] %s360_s11 }
  0x15   :  { %175 = vmatpush.bf16.msra.mxu1 %v481_v2  ;;  %v478_v6 = vld [vmem:[#allocation7 + $0x20] sm:$0xff]  ;;  %v477_v7 = vld [vmem:[#allocation7 + $0x18] sm:$0xff]  ;;  %v476_v8 = vld [vmem:[#allocation7 + $0x10] sm:$0xff] }
  0x16   :  { %v475_v9 = vld [vmem:[#allocation7 + $0x8] sm:$0xff]  ;;  %v474_v10 = vld [vmem:[#allocation7] sm:$0xff]  ;;  %v489_v11 = vld [vmem:[#allocation7 + $0x78] sm:$0xff] }
  0x17   :  { %376 = vmatmul.msk.bf16.vlgmr.msra.gmra.mxu0 %vm90_vm0, %v79_v3  ;;  %257 = vmatpush.bf16.msra.mxu2 %v489_v11  ;;  %v488_v12 = vld [vmem:[#allocation7 + $0x70] sm:$0xff]  ;;  %v487_v13 = vld [vmem:[#allocation7 + $0x68] sm:$0xff]  ;;  %v486_v14 = vld [vmem:[#allocation7 + $0x60] sm:$0xff] }
  0x18   :  { %v485_v15 = vld [vmem:[#allocation7 + $0x58] sm:$0xff]  ;;  %v505_v16 = vld [vmem:[#allocation8] ss:$0 sm:$0xff]  ;;  %v484_v22 = vld [vmem:[#allocation7 + $0x50] sm:$0xff] }
  0x19   :  { %176 = vmatpush.bf16.msra.mxu1 %v480_v4  ;;  %v483_v23 = vld [vmem:[#allocation7 + $0x48] sm:$0xff]  ;;  %v482_v24 = vld [vmem:[#allocation7 + $0x40] sm:$0xff]  ;;  %v497_v25 = vld [vmem:[#allocation7 + $0xb8] sm:$0xff] }
  0x1a   :  { %339 = vmatpush.bf16.msra.mxu3 %v497_v25  ;;  %v496_v26 = vld [vmem:[#allocation7 + $0xb0] sm:$0xff]  ;;  %v495_v27 = vld [vmem:[#allocation7 + $0xa8] sm:$0xff]  ;;  %v494_v28 = vld [vmem:[#allocation7 + $0xa0] sm:$0xff] }
  0x1b   :  { %258 = vmatpush.bf16.msra.mxu2 %v488_v12  ;;  %v493_v29 = vld [vmem:[#allocation7 + $0x98] sm:$0xff]  ;;  %v506_v30 = vld [vmem:[#allocation8 + $0x1] ss:$0 sm:$0xff]  ;;  %v492_v36 = vld [vmem:[#allocation7 + $0x90] sm:$0xff] }
  0x1c   :  { %v491_v37 = vld [vmem:[#allocation7 + $0x88] sm:$0xff]  ;;  %v490_v38 = vld [vmem:[#allocation7 + $0x80] sm:$0xff] }
  0x1d   :  { %177 = vmatpush.bf16.msra.mxu1 %v479_v5  ;;  %v507_v39 = vld [vmem:[#allocation8 + $0x2] ss:$0 sm:$0xff]  ;;  %v508_v45 = vld [vmem:[#allocation8 + $0x3] ss:$0 sm:$0xff] }
  0x1e   :  { %340 = vmatpush.bf16.msra.mxu3 %v496_v26 }
  0x1f   :  { %259 = vmatpush.bf16.msra.mxu2 %v487_v13 }
  0x21   :  { %178 = vmatpush.bf16.msra.mxu1 %v478_v6 }
  0x22   :  { %341 = vmatpush.bf16.msra.mxu3 %v495_v27 }
  0x23   :  { %260 = vmatpush.bf16.msra.mxu2 %v486_v14 }
  0x25   :  { %179 = vmatpush.bf16.msra.mxu1 %v477_v7 }
  0x26   :  { %342 = vmatpush.bf16.msra.mxu3 %v494_v28 }
  0x27   :  { %261 = vmatpush.bf16.msra.mxu2 %v485_v15 }
  0x29   :  { %180 = vmatpush.bf16.msra.mxu1 %v476_v8 }
  0x2a   :  { %343 = vmatpush.bf16.msra.mxu3 %v493_v29 }
  0x2b   :  { %262 = vmatpush.bf16.msra.mxu2 %v484_v22 }
  0x2d   :  { %181 = vmatpush.bf16.msra.mxu1 %v475_v9 }
  0x2e   :  { %344 = vmatpush.bf16.msra.mxu3 %v492_v36 }
  0x2f   :  { %263 = vmatpush.bf16.msra.mxu2 %v483_v23 }
  0x31   :  { %182 = vmatpush.bf16.msra.mxu1 %v474_v10 }
  0x32   :  { %345 = vmatpush.bf16.msra.mxu3 %v491_v37 }
  0x33   :  { %264 = vmatpush.bf16.msra.mxu2 %v482_v24 }
  0x36   :  { %346 = vmatpush.bf16.msra.mxu3 %v490_v38 }
  0x94   :  { %v103_v17 = vpop.f32.mrf.mxu0 }
  0x95   :  { %v104_v18 = vadd.f32 %v505_v16, %v103_v17 }
  0x97   :  { %509 = vtanh.f32 %v104_v18 }
  0x9c   :  { %v105_v19 = vpop.f32.mrf.mxu0 }
  0x9d   :  { %v510_v20 = vpop.eup %509 }
  0x9e   :  { %v108_v21 = vpack.c.bf16 %v510_v20, %v510_v20 }
  0xa0   :  { %183 = vmatmul.bf16.vlgmr.msra.gmra.mxu1 %v108_v21 }
 0x11d   :  { %v184_v31 = vpop.f32.mrf.mxu1 }
 0x11e   :  { %v185_v32 = vadd.f32 %v506_v30, %v184_v31 }
 0x120   :  { %511 = vtanh.f32 %v185_v32 }
 0x125   :  { %v186_v33 = vpop.f32.mrf.mxu1 }
 0x126   :  { %v512_v34 = vpop.eup %511 }
 0x127   :  { %v189_v35 = vpack.c.bf16 %v512_v34, %v512_v34 }
 0x129   :  { %265 = vmatmul.bf16.vlgmr.msra.gmra.mxu2 %v189_v35 }
 0x1ac   :  { %v266_v40 = vpop.f32.mrf.mxu2 }
 0x1ad   :  { %v267_v41 = vadd.f32 %v507_v39, %v266_v40 }
 0x1af   :  { %513 = vtanh.f32 %v267_v41 }
 0x1b4   :  { %v268_v42 = vpop.f32.mrf.mxu2 }
 0x1b5   :  { %v514_v43 = vpop.eup %513 }
 0x1b6   :  { %v271_v44 = vpack.c.bf16 %v514_v43, %v514_v43 }
 0x1b8   :  { %347 = vmatmul.bf16.vlgmr.msra.gmra.mxu3 %v271_v44 }
 0x23b   :  { %v348_v46 = vpop.f32.mrf.mxu3 }
 0x23c   :  { %v349_v47 = vadd.f32 %v508_v45, %v348_v46 }
 0x23e   :  { %352 = vst [vmem:[#allocation10] sm:$0xff] %v349_v47 }
 0x23f   :  { %363 = dma.vmem_to_hbm [thread:$0]  %s359_s3, 128, %s361_s11, [#allocation4]  }
 0x243   :  { %v350_v48 = vpop.f32.mrf.mxu3 }
 0x244   :  { %641 = dma.done.wait [#allocation4], 128  }
 0x245   :  { %642 = vsyncadd [#allocation4], 4294967168 }
 0x246   :  { %368 = vsyncpa [#allocation3], 1 }
 0x247   :  { %369 = vsyncpa [#allocation6], 1 }
 0x248   :  { %370 = vsyncpa [#allocation9], 1 }
 0x249   :  { %371 = vsyncpa [#allocation4], 1 }

</bundles_post_ra>
